<compile_context>
chip_gen: v7x
topology: tpu7x:2x2x1
jax: 0.10.0
libtpu: 0.0.40
codegen_flags: <defaults>
</compile_context>

<pallas_src>
import functools

import jax
import jax.numpy as jnp
from jax.experimental import pallas as pl
from jax.experimental.pallas import tpu as pltpu

BN_EPS = 1e-5
LANE = 128
VMEM_BUDGET_BYTES = 12 << 20  # conservative: fits default scoped VMEM on v5e


def _round_up(x, m):
    return (x + m - 1) // m * m


# ----------------------------------------------------------------------------
# Pass 1: tiled conv (im2col matmul) + per-tile channel sum / sum-of-squares.
# ----------------------------------------------------------------------------
def _conv_stats_kernel(p_ref, w_ref, conv_ref, stats_ref):
    # p_ref:     (TM, Kp)  bf16 im2col patch tile
    # w_ref:     (Kp, Cp)  bf16 weight matrix (constant block)
    # conv_ref:  (TM, Cp)  bf16 conv output tile
    # stats_ref: (2,  Cp)  f32  per-tile stats: row 0 = sum, row 1 = sum(x^2)
    acc = jnp.dot(p_ref[...], w_ref[...], preferred_element_type=jnp.float32)
    conv_ref[...] = acc.astype(conv_ref.dtype)

    s = jnp.sum(acc, axis=0, keepdims=True)          # (1, Cp)
    sq = jnp.sum(acc * acc, axis=0, keepdims=True)   # (1, Cp)
    stats_ref[...] = jnp.concatenate([s, sq], axis=0)


# ----------------------------------------------------------------------------
# Pass 2: tiled BatchNorm affine (pre-folded scale/shift) + PReLU.
# ----------------------------------------------------------------------------
def _bn_prelu_kernel(conv_ref, scale_ref, shift_ref, alpha_ref, out_ref):
    # conv_ref:  (TM, Cp) bf16
    # scale_ref: (1,  Cp) f32   gamma * rsqrt(var + eps)
    # shift_ref: (1,  Cp) f32   beta - mean * scale
    # alpha_ref: (1,)     f32   PReLU slope, in SMEM
    y = conv_ref[...].astype(jnp.float32) * scale_ref[...] + shift_ref[...]
    alpha = alpha_ref[0]
    out_ref[...] = jnp.where(y > 0, y, alpha * y).astype(out_ref.dtype)


# ----------------------------------------------------------------------------
# Wrapper glue (plain JAX): layout, im2col, padding, stats -> scale/shift.
# ----------------------------------------------------------------------------
def _im2col_nhwc(x_nhwc, ho, wo):
    """3x3 stride-2 pad-1 patches -> (N*Ho*Wo, 9*Cin), minor order (kh, kw, cin)."""
    n, h, w, c = x_nhwc.shape
    xp = jnp.pad(x_nhwc, ((0, 0), (1, 1), (1, 1), (0, 0)))
    cols = []
    for kh in range(3):
        for kw in range(3):
            sl = jax.lax.slice(
                xp,
                (0, kh, kw, 0),
                (n, kh + 2 * (ho - 1) + 1, kw + 2 * (wo - 1) + 1, c),
                (1, 2, 2, 1),
            )  # (N, Ho, Wo, Cin)
            cols.append(sl)
    patches = jnp.stack(cols, axis=3)                 # (N, Ho, Wo, 9, Cin)
    return patches.reshape(n * ho * wo, 9 * c)


def _pick_tile_m(m, kp, cp, tile_m):
    """Largest M tile (multiple of 8, <= tile_m) whose pass-1 double-buffered
    footprint fits the VMEM budget."""
    tm = _round_up(min(tile_m, _round_up(m, 8)), 8)

    def footprint(t):
        return (2 * t * kp * 2        # patch tile, bf16, double buffered
                + 2 * kp * cp * 2     # weight block, bf16, double buffered
                + 2 * t * cp * 2      # conv out tile, bf16, double buffered
                + 2 * 2 * cp * 4)     # stats block, f32

    while tm > 8 and footprint(tm) > VMEM_BUDGET_BYTES:
        tm = _round_up(tm // 2, 8)
    return tm


@functools.partial(jax.jit, static_argnames=("tile_m",))
def downsample_forward(x_nchw, conv_w, bn_gamma, bn_beta, prelu_alpha, *,
                       tile_m=512):
    """x_nchw: (N, Cin, H, W); conv_w: (Cout, Cin, 3, 3). Returns NCHW f32."""
    n, cin, h, w = x_nchw.shape
    cout = conv_w.shape[0]
    ho = (h + 2 - 3) // 2 + 1
    wo = (w + 2 - 3) // 2 + 1
    m = n * ho * wo
    k = 9 * cin

    # Lane-dense padding.
    kp = _round_up(k, LANE)
    cp = _round_up(cout, LANE)

    # M tile: multiple of 8, sized to the VMEM budget; pad M to a whole grid.
    tm = _pick_tile_m(m, kp, cp, tile_m)
    mp = _round_up(m, tm)
    num_tiles = mp // tm

    # ---- glue: NCHW -> NHWC, bf16 im2col, zero-padded operands ----
    x_nhwc = jnp.transpose(x_nchw, (0, 2, 3, 1)).astype(jnp.bfloat16)
    patches = _im2col_nhwc(x_nhwc, ho, wo)                        # (m, k) bf16
    patches = jnp.pad(patches, ((0, mp - m), (0, kp - k)))
    w_mat = jnp.transpose(conv_w, (2, 3, 1, 0)).reshape(k, cout)
    w_mat = jnp.pad(w_mat, ((0, kp - k), (0, cp - cout))).astype(jnp.bfloat16)

    # ---- pass 1: tiled conv (bf16 out) + per-tile channel sum / sumsq ----
    conv2d, stats = pl.pallas_call(
        _conv_stats_kernel,
        out_shape=(jax.ShapeDtypeStruct((mp, cp), jnp.bfloat16),
                   jax.ShapeDtypeStruct((num_tiles, 2, cp), jnp.float32)),
        grid=(num_tiles,),
        in_specs=[
            pl.BlockSpec((tm, kp), lambda i: (i, 0)),
            pl.BlockSpec((kp, cp), lambda i: (0, 0)),
        ],
        out_specs=(
            pl.BlockSpec((tm, cp), lambda i: (i, 0)),
            pl.BlockSpec((None, 2, cp), lambda i: (i, 0, 0)),  # per-tile stats
        ),
        compiler_params=pltpu.CompilerParams(
            dimension_semantics=("parallel",)),
        cost_estimate=pl.CostEstimate(
            flops=2 * mp * kp * cp,
            transcendentals=0,
            bytes_accessed=(mp * kp * 2 + kp * cp * 2
                            + mp * cp * 2 + num_tiles * 2 * cp * 4)),
    )(patches, w_mat)

    # ---- tiny per-channel reduction epilogue (plain JAX on (Cp,) vectors) ----
    # Zero-padded rows contribute 0 to both sums -> divide by the real M.
    stats_sum = jnp.sum(stats, axis=0)                   # (2, cp)
    mean = stats_sum[0] / m
    var = jnp.maximum(stats_sum[1] / m - mean * mean, 0.0)  # biased (training) var
    inv_std = jax.lax.rsqrt(var + BN_EPS)
    gamma_p = jnp.pad(bn_gamma.astype(jnp.float32), (0, cp - cout))
    beta_p = jnp.pad(bn_beta.astype(jnp.float32), (0, cp - cout))
    scale = (gamma_p * inv_std).reshape(1, cp)
    shift = (beta_p - mean * gamma_p * inv_std).reshape(1, cp)
    alpha = prelu_alpha.reshape(1).astype(jnp.float32)

    # ---- pass 2: tiled normalize + PReLU ----
    out2d = pl.pallas_call(
        _bn_prelu_kernel,
        out_shape=jax.ShapeDtypeStruct((mp, cp), jnp.float32),
        grid=(num_tiles,),
        in_specs=[
            pl.BlockSpec((tm, cp), lambda i: (i, 0)),
            pl.BlockSpec((1, cp), lambda i: (0, 0)),
            pl.BlockSpec((1, cp), lambda i: (0, 0)),
            pl.BlockSpec(memory_space=pltpu.MemorySpace.SMEM),   # PReLU alpha
        ],
        out_specs=pl.BlockSpec((tm, cp), lambda i: (i, 0)),
        compiler_params=pltpu.CompilerParams(
            dimension_semantics=("parallel",)),
        cost_estimate=pl.CostEstimate(
            flops=4 * mp * cp,
            transcendentals=0,
            bytes_accessed=mp * cp * 2 + mp * cp * 4 + 2 * cp * 4),
    )(conv2d, scale, shift, alpha)

    out_nhwc = out2d[:m, :cout].reshape(n, ho, wo, cout)
    return jnp.transpose(out_nhwc, (0, 3, 1, 2))                  # back to NCHW


# ----------------------------------------------------------------------------
# Pure-JAX reference (f32) for correctness checking.
# ----------------------------------------------------------------------------
def _reference_forward(x_nchw, conv_w, bn_gamma, bn_beta, prelu_alpha):
    conv = jax.lax.conv_general_dilated(
        x_nchw, conv_w, window_strides=(2, 2), padding=((1, 1), (1, 1)),
        dimension_numbers=("NCHW", "OIHW", "NCHW"))
    mean = jnp.mean(conv, axis=(0, 2, 3), keepdims=True)
    var = jnp.mean((conv - mean) ** 2, axis=(0, 2, 3), keepdims=True)
    y = (conv - mean) * jax.lax.rsqrt(var + BN_EPS)
    y = y * bn_gamma.reshape(1, -1, 1, 1) + bn_beta.reshape(1, -1, 1, 1)
    return jnp.where(y > 0, y, prelu_alpha * y)


if __name__ == "__main__":
    key = jax.random.PRNGKey(0)
    k_x, k_w, k_g, k_b = jax.random.split(key, 4)

    N, Cin, H, W = 2, 4, 16, 16
    Cout = 4  # must equal Cin for BatchNorm2d(in_channels) to be applicable

    x = jax.random.normal(k_x, (N, Cin, H, W), dtype=jnp.float32)
    conv_w = 0.1 * jax.random.normal(k_w, (Cout, Cin, 3, 3), dtype=jnp.float32)
    bn_gamma = 1.0 + 0.05 * jax.random.normal(k_g, (Cout,), dtype=jnp.float32)
    bn_beta = 0.05 * jax.random.normal(k_b, (Cout,), dtype=jnp.float32)
    prelu_alpha = jnp.array(0.25, dtype=jnp.float32)  # nn.PReLU() default

    # tile_m=64 -> 2 grid steps at this size, exercising the tiled per-block
    # BN-stats path (production default is 512-row tiles).
    out = downsample_forward(x, conv_w, bn_gamma, bn_beta, prelu_alpha,
                             tile_m=64)
    out = jax.block_until_ready(out)

    ref = _reference_forward(x, conv_w, bn_gamma, bn_beta, prelu_alpha)
    assert out.shape == (N, Cout, H // 2, W // 2), out.shape
    err = float(jnp.max(jnp.abs(out - ref)))
    assert err < 5e-2, err  # bf16 MXU operands / bf16 conv tile vs f32 reference

    print("KERNEL_OK")
</pallas_src>

<mosaic_0001>
module attributes {stable_mosaic.version = 11 : i64} {
  func.func @_conv_stats_kernel(%arg0: i32, %arg1: memref<64x128xbf16, #tpu.memory_space<vmem>>, %arg2: memref<128x128xbf16, #tpu.memory_space<vmem>>, %arg3: memref<64x128xbf16, #tpu.memory_space<vmem>>, %arg4: memref<1x2x128xf32, #tpu.memory_space<vmem>>) attributes {dimension_semantics = [#tpu.dimension_semantics<parallel>], iteration_bounds = array<i64: 2>, scalar_prefetch = 0 : i64, scratch_operands = 0 : i64, tpu.core_type = #tpu.core_type<tc>, window_params = [{transform_indices = @transform_0, window_bounds = array<i64: 64, 128>}, {pipeline_mode = #tpu.pipeline_mode<synchronous>, transform_indices = @transform_1, window_bounds = array<i64: 128, 128>}, {transform_indices = @transform_2, window_bounds = array<i64: 64, 128>}, {transform_indices = @transform_3, window_bounds = array<i64: 1, 2, 128>}]} {
    %c0 = arith.constant 0 : index
    %c0_0 = arith.constant 0 : index
    %0 = vector.load %arg1[%c0, %c0_0] : memref<64x128xbf16, #tpu.memory_space<vmem>>, vector<64x128xbf16>
    %c0_1 = arith.constant 0 : index
    %c0_2 = arith.constant 0 : index
    %1 = vector.load %arg2[%c0_1, %c0_2] : memref<128x128xbf16, #tpu.memory_space<vmem>>, vector<128x128xbf16>
    %cst = arith.constant dense<0.000000e+00> : vector<64x128xf32>
    %2 = tpu.matmul %0, %1, %cst {dimension_numbers = #tpu.dot_dimension_numbers<[1], [0], [0], [1], [0, 0, 1, 1], [], []>} : vector<64x128xbf16>, vector<128x128xbf16>, vector<64x128xf32> -> vector<64x128xf32>
    %3 = arith.truncf %2 : vector<64x128xf32> to vector<64x128xbf16>
    %c0_3 = arith.constant 0 : index
    %c0_4 = arith.constant 0 : index
    %4 = vector.load %arg3[%c0_3, %c0_4] : memref<64x128xbf16, #tpu.memory_space<vmem>>, vector<64x128xbf16>
    tpu.vector_store %arg3[%c0_3, %c0_4], %3 {strides = array<i32>} : memref<64x128xbf16, #tpu.memory_space<vmem>>, vector<64x128xbf16>,
    %cst_5 = arith.constant dense<0.000000e+00> : vector<128xf32>
    %5 = vector.multi_reduction <add>, %2, %cst_5 [0] : vector<64x128xf32> to vector<128xf32>
    %6 = vector.shape_cast %5 : vector<128xf32> to vector<1x128xf32>
    %7 = arith.mulf %2, %2 : vector<64x128xf32>
    %cst_6 = arith.constant dense<0.000000e+00> : vector<128xf32>
    %8 = vector.multi_reduction <add>, %7, %cst_6 [0] : vector<64x128xf32> to vector<128xf32>
    %9 = vector.shape_cast %8 : vector<128xf32> to vector<1x128xf32>
    %10 = tpu.concatenate %6, %9 in 0 : vector<1x128xf32>, vector<1x128xf32> -> vector<2x128xf32>
    %c0_7 = arith.constant 0 : index
    %c0_8 = arith.constant 0 : index
    %c0_9 = arith.constant 0 : index
    %11 = vector.load %arg4[%c0_7, %c0_8, %c0_9] : memref<1x2x128xf32, #tpu.memory_space<vmem>>, vector<1x2x128xf32>
    %12 = vector.shape_cast %11 : vector<1x2x128xf32> to vector<2x128xf32>
    %13 = vector.shape_cast %10 : vector<2x128xf32> to vector<1x2x128xf32>
    tpu.vector_store %arg4[%c0_7, %c0_8, %c0_9], %13 {strides = array<i32>} : memref<1x2x128xf32, #tpu.memory_space<vmem>>, vector<1x2x128xf32>,
    return
  }
  func.func @transform_0(%arg0: i32) -> (i32, i32) {
    %c0_i32 = arith.constant 0 : i32
    %c0_i32_0 = arith.constant 0 : i32
    return %arg0, %c0_i32 : i32, i32
  }
  func.func @transform_1(%arg0: i32) -> (i32, i32) {
    %c0_i32 = arith.constant 0 : i32
    %c0_i32_0 = arith.constant 0 : i32
    %c0_i32_1 = arith.constant 0 : i32
    return %c0_i32, %c0_i32_0 : i32, i32
  }
  func.func @transform_2(%arg0: i32) -> (i32, i32) {
    %c0_i32 = arith.constant 0 : i32
    %c0_i32_0 = arith.constant 0 : i32
    return %arg0, %c0_i32 : i32, i32
  }
  func.func @transform_3(%arg0: i32) -> (i32, i32, i32) {
    %c0_i32 = arith.constant 0 : i32
    %c0_i32_0 = arith.constant 0 : i32
    %c0_i32_1 = arith.constant 0 : i32
    return %arg0, %c0_i32, %c0_i32_0 : i32, i32, i32
  }
}

module attributes {stable_mosaic.version = 11 : i64} {
  func.func @_bn_prelu_kernel(%arg0: i32, %arg1: memref<64x128xbf16, #tpu.memory_space<vmem>>, %arg2: memref<1x128xf32, #tpu.memory_space<vmem>>, %arg3: memref<1x128xf32, #tpu.memory_space<vmem>>, %arg4: memref<1xf32, #tpu.memory_space<smem>>, %arg5: memref<64x128xf32, #tpu.memory_space<vmem>>) attributes {dimension_semantics = [#tpu.dimension_semantics<parallel>], iteration_bounds = array<i64: 2>, scalar_prefetch = 0 : i64, scratch_operands = 0 : i64, tpu.core_type = #tpu.core_type<tc>, window_params = [{transform_indices = @transform_0, window_bounds = array<i64: 64, 128>}, {pipeline_mode = #tpu.pipeline_mode<synchronous>, transform_indices = @transform_1, window_bounds = array<i64: 1, 128>}, {pipeline_mode = #tpu.pipeline_mode<synchronous>, transform_indices = @transform_2, window_bounds = array<i64: 1, 128>}, {transform_indices = @transform_3, window_bounds = array<i64: 1>}, {transform_indices = @transform_4, window_bounds = array<i64: 64, 128>}]} {
    %c0 = arith.constant 0 : index
    %c0_0 = arith.constant 0 : index
    %0 = vector.load %arg1[%c0, %c0_0] : memref<64x128xbf16, #tpu.memory_space<vmem>>, vector<64x128xbf16>
    %1 = arith.extf %0 : vector<64x128xbf16> to vector<64x128xf32>
    %c0_1 = arith.constant 0 : index
    %c0_2 = arith.constant 0 : index
    %2 = vector.load %arg2[%c0_1, %c0_2] : memref<1x128xf32, #tpu.memory_space<vmem>>, vector<1x128xf32>
    %3 = vector.broadcast %2 : vector<1x128xf32> to vector<64x128xf32>
    %4 = arith.mulf %1, %3 : vector<64x128xf32>
    %c0_3 = arith.constant 0 : index
    %c0_4 = arith.constant 0 : index
    %5 = vector.load %arg3[%c0_3, %c0_4] : memref<1x128xf32, #tpu.memory_space<vmem>>, vector<1x128xf32>
    %6 = vector.broadcast %5 : vector<1x128xf32> to vector<64x128xf32>
    %7 = arith.addf %4, %6 : vector<64x128xf32>
    %c0_5 = arith.constant 0 : index
    %8 = memref.load %arg4[%c0_5] : memref<1xf32, #tpu.memory_space<smem>>
    %cst = arith.constant 0.000000e+00 : f32
    %9 = vector.broadcast %cst : f32 to vector<64x128xf32>
    %10 = arith.cmpf ogt, %7, %9 : vector<64x128xf32>
    %11 = vector.broadcast %8 : f32 to vector<64x128xf32>
    %12 = arith.mulf %11, %7 : vector<64x128xf32>
    %13 = arith.select %10, %7, %12 : vector<64x128xi1>, vector<64x128xf32>
    %c0_6 = arith.constant 0 : index
    %c0_7 = arith.constant 0 : index
    %14 = vector.load %arg5[%c0_6, %c0_7] : memref<64x128xf32, #tpu.memory_space<vmem>>, vector<64x128xf32>
    tpu.vector_store %arg5[%c0_6, %c0_7], %13 {strides = array<i32>} : memref<64x128xf32, #tpu.memory_space<vmem>>, vector<64x128xf32>,
    return
  }
  func.func @transform_0(%arg0: i32) -> (i32, i32) {
    %c0_i32 = arith.constant 0 : i32
    %c0_i32_0 = arith.constant 0 : i32
    return %arg0, %c0_i32 : i32, i32
  }
  func.func @transform_1(%arg0: i32) -> (i32, i32) {
    %c0_i32 = arith.constant 0 : i32
    %c0_i32_0 = arith.constant 0 : i32
    %c0_i32_1 = arith.constant 0 : i32
    return %c0_i32, %c0_i32_0 : i32, i32
  }
  func.func @transform_2(%arg0: i32) -> (i32, i32) {
    %c0_i32 = arith.constant 0 : i32
    %c0_i32_0 = arith.constant 0 : i32
    %c0_i32_1 = arith.constant 0 : i32
    return %c0_i32, %c0_i32_0 : i32, i32
  }
  func.func @transform_3(%arg0: i32) -> i32 {
    %c0_i32 = arith.constant 0 : i32
    %c0_i32_0 = arith.constant 0 : i32
    return %c0_i32 : i32
  }
  func.func @transform_4(%arg0: i32) -> (i32, i32) {
    %c0_i32 = arith.constant 0 : i32
    %c0_i32_0 = arith.constant 0 : i32
    return %arg0, %c0_i32 : i32, i32
  }
}

</mosaic_0001>

<bundles_post_ra>
// kernel: downsample_forward.3
= control target key start
LH: loop header
LB: loop body
LE: loop exit
PB: predicated region body
PF: predicated region fallthrough
CT: control target
= control target key end

     0   :  { %s414_s17 = smov 0   ;;  %s451_s0 = inlined_call_operand.vmem [shape: bf16[128,128], index: 0, kind: input, shape index: {}]   ;;  %s452_s1 = inlined_call_operand.vmem [shape: f32[1,128], index: 1, kind: input, shape index: {}]   ;;  %s453_s2 = inlined_call_operand.vmem [shape: f32[1,128], index: 2, kind: input, shape index: {}]   ;;  %s454_s3 = inlined_call_operand.<no memory space> [shape: f32[1], index: 3, kind: input, shape index: {}]   ;;  %s455_s4 = inlined_call_operand.vmem [shape: f32[128,128], index: 4, kind: output, shape index: {}]  }
   0x1   :  { %9 = sst [smem:[#allocation2]] %s454_s3 }
   0x2 LB: > { %s338_s18 = sadd.s32 4294967295, %s384_s17   ;;  %p342_p0 = scmp.ge.s32.totalorder %s384_s17, 1  ;;  %s384_s17 = sphi %s414_s17, %s15_s17  }
   0x3   : > { %p164_p1 = scmp.lt.s32.totalorder %s384_s17, 3 }
   0x5   : > { %p165_p2 = pnand %p342_p0, %p164_p1 }
   0x6   : > { %s343_s19 = sshll.u32 (!%p165_p2), %s338_s18, 3  ;;  %s248_s20 = sld [smem:[#allocation2]] (!%p165_p2)  ;;  %v347_v0 = vld [vmem:[%s452_s1] ss:$0 sm:$0xff] (!%p165_p2) }
   0x7   : > { %168 = sbr.rel (%p165_p2) target bundleno = 33 (0x21), region = 36  ;;  %p191_p3 = scmp.lt.s32.totalorder (!%p165_p2), %s343_s19, 15  ;;  %v348_v10 = vld [vmem:[%s453_s2] ss:$0 sm:$0xff] (!%p165_p2) }
   0xc   : > { %v257_v2 = vstv (!%p165_p2), %s248_s20 }
   0xe   : > { %s457_s19 = smov (!%p191_p3, %s343_s19), 15 }
   0xf   : > { %s344_s3 = sshll.u32 %s457_s19, 2  ;;  %s346_s28 = sshll.u32 %s457_s19, 3 }
  0x10   : > { %s194_s23 = scalar_lea.vmem %s451_s0, %s344_s3  ;;  %s438_s5 = scalar_lea.vmem %s455_s4, %s346_s28 }
  0x11   : > { %v352_v1 = vld [vmem:[%s194_s23] sm:$0xff]   ;;  %v367_v3 = vld [vmem:[%s194_s23 + $0x8] sm:$0xff]   ;;  %v368_v4 = vld [vmem:[%s194_s23 + $0x10] sm:$0xff]  }
  0x12   : > { %v353_v5 = vunpack.c.l.bf16 %v352_v1  ;;  %v354_v6 = vunpack.c.h.bf16 %v352_v1  ;;  %v357_v7 = vunpack.c.l.bf16 %v367_v3  ;;  %v358_v8 = vunpack.c.h.bf16 %v367_v3  ;;  %v369_v9 = vld [vmem:[%s194_s23 + $0x18] sm:$0xff]  }
  0x13   : > { %v361_v11 = vunpack.c.l.bf16 %v368_v4  ;;  %v362_v12 = vunpack.c.h.bf16 %v368_v4  ;;  %v365_v13 = vunpack.c.l.bf16 %v369_v9  ;;  %v366_v14 = vunpack.c.h.bf16 %v369_v9 }
  0x14   : > { %v225_v15 = vmul.f32 %v353_v5, %v347_v0  ;;  %v226_v16 = vmul.f32 %v354_v6, %v347_v0  ;;  %v227_v17 = vmul.f32 %v357_v7, %v347_v0  ;;  %v228_v18 = vmul.f32 %v358_v8, %v347_v0 }
  0x15   : > { %v229_v19 = vmul.f32 %v361_v11, %v347_v0  ;;  %v230_v20 = vmul.f32 %v362_v12, %v347_v0  ;;  %v231_v21 = vmul.f32 %v365_v13, %v347_v0  ;;  %v232_v22 = vmul.f32 %v366_v14, %v347_v0 }
  0x16   : > { %v240_v23 = vadd.f32 %v348_v10, %v225_v15  ;;  %v241_v24 = vadd.f32 %v348_v10, %v226_v16  ;;  %v242_v25 = vadd.f32 %v348_v10, %v227_v17  ;;  %v243_v26 = vadd.f32 %v348_v10, %v228_v18 }
  0x17   : > { %v244_v27 = vadd.f32 %v348_v10, %v229_v19  ;;  %v245_v28 = vadd.f32 %v348_v10, %v230_v20  ;;  %v246_v29 = vadd.f32 %v348_v10, %v231_v21  ;;  %v247_v30 = vadd.f32 %v348_v10, %v232_v22 }
  0x18   : > { %vm249_vm0 = vcmp.gt.f32.partialorder %v240_v23, 0.0  ;;  %v258_v31 = vmul.f32 %v257_v2, %v240_v23  ;;  %vm250_vm1 = vcmp.gt.f32.partialorder %v241_v24, 0.0  ;;  %v259_v32 = vmul.f32 %v257_v2, %v241_v24 }
  0x19   : > { %vm251_vm2 = vcmp.gt.f32.partialorder %v242_v25, 0.0  ;;  %v260_v33 = vmul.f32 %v257_v2, %v242_v25  ;;  %vm252_vm3 = vcmp.gt.f32.partialorder %v243_v26, 0.0  ;;  %v261_v34 = vmul.f32 %v257_v2, %v243_v26 }
  0x1a   : > { %v266_v35 = vsel %vm249_vm0, %v240_v23, %v258_v31  ;;  %v267_v36 = vsel %vm250_vm1, %v241_v24, %v259_v32  ;;  %vm253_vm4 = vcmp.gt.f32.partialorder %v244_v27, 0.0  ;;  %v262_v37 = vmul.f32 %v257_v2, %v244_v27 }
  0x1b   : > { %274 = vst [vmem:[%s438_s5] sm:$0xff] %v266_v35  ;;  %275 = vst [vmem:[%s438_s5 + $0x8] sm:$0xff] %v267_v36  ;;  %v268_v38 = vsel %vm251_vm2, %v242_v25, %v260_v33  ;;  %v269_v39 = vsel %vm252_vm3, %v243_v26, %v261_v34  ;;  %vm254_vm5 = vcmp.gt.f32.partialorder %v245_v28, 0.0  ;;  %v263_v40 = vmul.f32 %v257_v2, %v245_v28 }
  0x1c   : > { %276 = vst [vmem:[%s438_s5 + $0x10] sm:$0xff] %v268_v38  ;;  %277 = vst [vmem:[%s438_s5 + $0x18] sm:$0xff] %v269_v39  ;;  %v270_v41 = vsel %vm253_vm4, %v244_v27, %v262_v37  ;;  %vm255_vm6 = vcmp.gt.f32.partialorder %v246_v29, 0.0  ;;  %v264_v42 = vmul.f32 %v257_v2, %v246_v29  ;;  %vm256_vm7 = vcmp.gt.f32.partialorder %v247_v30, 0.0 }
  0x1d   : > { %278 = vst [vmem:[%s438_s5 + $0x20] sm:$0xff] %v270_v41  ;;  %v271_v43 = vsel %vm254_vm5, %v245_v28, %v263_v40  ;;  %v265_v44 = vmul.f32 %v257_v2, %v247_v30 }
  0x1e   : > { %279 = vst [vmem:[%s438_s5 + $0x28] sm:$0xff] %v271_v43  ;;  %v272_v45 = vsel %vm255_vm6, %v246_v29, %v264_v42 }
  0x1f   : > { %280 = vst [vmem:[%s438_s5 + $0x30] sm:$0xff] %v272_v45  ;;  %v273_v46 = vsel %vm256_vm7, %v247_v30, %v265_v44 }
  0x20   : > { %281 = vst [vmem:[%s438_s5 + $0x38] sm:$0xff] %v273_v46 }
  0x21 PF: > { %s15_s17 = sadd.s32 1, %s384_s17  }
  0x22   : > { %p12_p4 = scmp.ge.s32.totalorder %s15_s17, 4  }
  0x24   :  { %14 = sbr.rel (!%p12_p4) target bundleno = 2 (0x2), region = 66 }

// kernel: downsample_forward.2
= control target key start
LH: loop header
LB: loop body
LE: loop exit
PB: predicated region body
PF: predicated region fallthrough
CT: control target
= control target key end

     0   :  { %s674_s12 = smov 0   ;;  %s736_s0 = inlined_call_operand.vmem [shape: bf16[128,128], index: 0, kind: input, shape index: {}]   ;;  %s737_s1 = inlined_call_operand.vmem [shape: bf16[128,128], index: 1, kind: input, shape index: {}]   ;;  %s738_s2 = inlined_call_operand.vmem [shape: bf16[128,128], index: 2, kind: output, shape index: {0}]   ;;  %s739_s3 = inlined_call_operand.vmem [shape: f32[2,2,128], index: 3, kind: output, shape index: {1}]  }
   0x1 LB: > { %s680_s13 = sadd.s32 4294967295, %s652_s12   ;;  %p515_p0 = scmp.ge.s32.totalorder %s652_s12, 1  ;;  %s652_s12 = sphi %s674_s12, %s14_s12  }
   0x2   : > { %p141_p1 = scmp.lt.s32.totalorder %s652_s12, 3 }
   0x4   : > { %p142_p2 = pnand %p515_p0, %p141_p1 }
   0x5   : > { %v634_v0 = vld [vmem:[%s737_s1] sm:$0xff] (!%p142_p2)   ;;  %s516_s16 = sshll.u32 (!%p142_p2), %s680_s13, 3  ;;  %v635_v1 = vld [vmem:[%s737_s1 + $0x8] sm:$0xff] (!%p142_p2)   ;;  %v636_v2 = vld [vmem:[%s737_s1 + $0x10] sm:$0xff] (!%p142_p2)   ;;  %p181_p4 = scmp.lt.s32.totalorder (!%p142_p2), %s680_s13, 1  ;;  %vm421_vm0 = vcmask (!%p142_p2), 1040384  }
   0x6   : > { %145 = sbr.rel (%p142_p2) target bundleno = 283 (0x11b), region = 28  ;;  %p170_p3 = scmp.lt.s32.totalorder (!%p142_p2), %s516_s16, 15  ;;  %586 = vmatprep.subr.bf16.mxu0 (!%p142_p2), %v634_v0  ;;  %610 = vmatprep.subr.bf16.mxu1 (!%p142_p2), %v634_v0  ;;  %v637_v3 = vld [vmem:[%s737_s1 + $0x18] sm:$0xff] (!%p142_p2)   ;;  %v638_v6 = vld [vmem:[%s737_s1 + $0x20] sm:$0xff] (!%p142_p2)   ;;  %v639_v7 = vld [vmem:[%s737_s1 + $0x28] sm:$0xff] (!%p142_p2)  }
   0x7   : > { %587 = vmatpush3.bf16.msra.mxu0 (!%p142_p2), %v634_v0  ;;  %618 = vmatpush3.bf16.msra.mxu1 (!%p142_p2), %v634_v0  ;;  %v640_v8 = vld [vmem:[%s737_s1 + $0x30] sm:$0xff] (!%p142_p2)   ;;  %v641_v9 = vld [vmem:[%s737_s1 + $0x38] sm:$0xff] (!%p142_p2)  }
   0x8   : > { %588 = vmatprep.subr.bf16.mxu0 (!%p142_p2), %v635_v1  ;;  %611 = vmatprep.subr.bf16.mxu1 (!%p142_p2), %v635_v1 }
   0xb   : > { %589 = vmatpush3.bf16.msra.mxu0 (!%p142_p2), %v635_v1  ;;  %619 = vmatpush3.bf16.msra.mxu1 (!%p142_p2), %v635_v1 }
   0xc   : > { %590 = vmatprep.subr.bf16.mxu0 (!%p142_p2), %v636_v2  ;;  %612 = vmatprep.subr.bf16.mxu1 (!%p142_p2), %v636_v2 }
   0xd   : > { %s741_s16 = smov (!%p170_p3, %s516_s16), 15  ;;  %s743_s13 = smov (!%p181_p4, %s680_s13), 1 }
   0xe   : > { %s517_s21 = sshll.u32 %s741_s16, 2  ;;  %s520_s11 = sshll.u32 %s743_s13, 1 }
   0xf   : > { %s702_s24 = scalar_lea.vmem %s736_s0, %s517_s21  ;;  %591 = vmatpush3.bf16.msra.mxu0 %v636_v2  ;;  %620 = vmatpush3.bf16.msra.mxu1 %v636_v2  ;;  %s179_s10 = scalar_lea.vmem %s738_s2, %s517_s21 }
  0x10   : > { %v642_v4 = vld [vmem:[%s702_s24] sm:$0xff]   ;;  %v644_v5 = vld [vmem:[%s702_s24 + $0x10] sm:$0xff]   ;;  %592 = vmatprep.subr.bf16.mxu0 %v637_v3  ;;  %613 = vmatprep.subr.bf16.mxu1 %v637_v3  ;;  %v643_v10 = vld [vmem:[%s702_s24 + $0x8] sm:$0xff]   ;;  %s184_s16 = scalar_lea.vmem %s739_s3, %s520_s11 }
  0x11   : > { %602 = vmatprep.mubr.bf16.mxu0 %v642_v4  ;;  %606 = vmatprep.mubr.bf16.mxu1 %v644_v5  ;;  %v645_v11 = vld [vmem:[%s702_s24 + $0x18] sm:$0xff]  }
  0x13   : > { %593 = vmatpush3.bf16.msra.mxu0 %v637_v3  ;;  %621 = vmatpush3.bf16.msra.mxu1 %v637_v3 }
  0x14   : > { %594 = vmatprep.subr.bf16.mxu0 %v638_v6  ;;  %614 = vmatprep.subr.bf16.mxu1 %v638_v6 }
  0x17   : > { %595 = vmatpush3.bf16.msra.mxu0 %v638_v6  ;;  %622 = vmatpush3.bf16.msra.mxu1 %v638_v6 }
  0x18   : > { %596 = vmatprep.subr.bf16.mxu0 %v639_v7  ;;  %615 = vmatprep.subr.bf16.mxu1 %v639_v7 }
  0x1b   : > { %597 = vmatpush3.bf16.msra.mxu0 %v639_v7  ;;  %623 = vmatpush3.bf16.msra.mxu1 %v639_v7 }
  0x1c   : > { %598 = vmatprep.subr.bf16.mxu0 %v640_v8  ;;  %616 = vmatprep.subr.bf16.mxu1 %v640_v8 }
  0x1f   : > { %599 = vmatpush3.bf16.msra.mxu0 %v640_v8  ;;  %624 = vmatpush3.bf16.msra.mxu1 %v640_v8 }
  0x20   : > { %600 = vmatprep.subr.bf16.mxu0 %v641_v9  ;;  %617 = vmatprep.subr.bf16.mxu1 %v641_v9 }
  0x23   : > { %601 = vmatpush3.bf16.msra.mxu0 %v641_v9  ;;  %625 = vmatpush3.bf16.msra.mxu1 %v641_v9 }
  0x26   : > { %603 = vmatmul.mubr.bf16.vlgmr.msra.gmra.mrb[0].mxu0 %v643_v10  ;;  %607 = vmatmul.mubr.bf16.vlgmr.msra.gmra.mrb[0].mxu1 %v645_v11 }
  0xf9   : > { %v604_v12 = vpop.f32.mrb[0].mxu0  ;;  %v608_v13 = vpop.f32.mrb[0].mxu1 }
  0xfa   : > { %v316_v14 = vpop.f32.mrb[1].mxu0  ;;  %v332_v15 = vpop.f32.mrb[1].mxu1  ;;  %v402_v27 = vmul.f32 %v604_v12, %v604_v12  ;;  %v406_v39 = vmul.f32 %v608_v13, %v608_v13 }
  0xfb   : > { %v605_v16 = vpop.f32.mrb[2].mxu0  ;;  %v609_v17 = vpop.f32.mrb[2].mxu1  ;;  %v400_v18 = vmul.f32 %v316_v14, %v316_v14  ;;  %v404_v33 = vmul.f32 %v332_v15, %v332_v15 }
  0xfc   : > { %v559_v19 = vpack.c.bf16 %v605_v16, %v604_v12  ;;  %v319_v20 = vpop.f32.mrb[3].mxu0  ;;  %v569_v21 = vpack.c.bf16 %v609_v17, %v608_v13  ;;  %v335_v22 = vpop.f32.mrb[3].mxu1  ;;  %v403_v30 = vmul.f32 %v605_v16, %v605_v16  ;;  %v407_v42 = vmul.f32 %v609_v17, %v609_v17 }
  0xfd   : > { %v554_v23 = vpack.c.bf16 %v319_v20, %v316_v14  ;;  %v387_v24 = vadd.f32 %v319_v20, %v316_v14  ;;  %v401_v25 = vmul.f32 %v319_v20, %v319_v20  ;;  %v564_v26 = vpack.c.bf16 %v335_v22, %v332_v15 }
  0xfe   : > { %571 = vst [vmem:[%s179_s10 + $0x8] sm:$0xff] %v559_v19   ;;  %573 = vst [vmem:[%s179_s10 + $0x18] sm:$0xff] %v569_v21   ;;  %v405_v38 = vmul.f32 %v335_v22, %v335_v22 }
  0xff   : > { %555 = vst [vmem:[%s179_s10] sm:$0xff] %v554_v23   ;;  %v388_v28 = vadd.f32 %v604_v12, %v387_v24  ;;  %v408_v29 = vadd.f32 %v401_v25, %v400_v18  ;;  %572 = vst [vmem:[%s179_s10 + $0x10] sm:$0xff] %v564_v26  }
 0x101   : > { %v409_v31 = vadd.f32 %v408_v29, %v402_v27  ;;  %v389_v32 = vadd.f32 %v605_v16, %v388_v28 }
 0x103   : > { %v390_v34 = vadd.f32 %v389_v32, %v332_v15  ;;  %v410_v35 = vadd.f32 %v409_v31, %v403_v30 }
 0x105   : > { %v411_v36 = vadd.f32 %v410_v35, %v404_v33  ;;  %v391_v37 = vadd.f32 %v390_v34, %v335_v22 }
 0x107   : > { %v392_v40 = vadd.f32 %v608_v13, %v391_v37  ;;  %v412_v41 = vadd.f32 %v411_v36, %v405_v38 }
 0x109   : > { %v393_v43 = vadd.f32 %v609_v17, %v392_v40  ;;  %v413_v44 = vadd.f32 %v412_v41, %v406_v39 }
 0x10b   : > { %v394_v45 = vrot.slane %v393_v43, 4  ;;  %v414_v46 = vadd.f32 %v413_v44, %v407_v42 }
 0x10d   : > { %v395_v47 = vadd.f32 %v394_v45, %v393_v43  ;;  %v415_v48 = vrot.slane %v414_v46, 4 }
 0x10f   : > { %v396_v49 = vrot.slane %v395_v47, 2  ;;  %v416_v50 = vadd.f32 %v415_v48, %v414_v46 }
 0x111   : > { %v397_v51 = vadd.f32 %v396_v49, %v395_v47  ;;  %v417_v52 = vrot.slane %v416_v50, 2 }
 0x113   : > { %v398_v53 = vrot.slane %v397_v51, 1  ;;  %v418_v54 = vadd.f32 %v417_v52, %v416_v50 }
 0x115   : > { %v419_v55 = vrot.slane %v418_v54, 1  ;;  %v399_v56 = vadd.f32 %v398_v53, %v397_v51 }
 0x117   : > { %v420_v57 = vadd.f32 %v419_v55, %v418_v54 }
 0x119   : > { %v422_v58 = vsel %vm421_vm0, %v399_v56, %v420_v57 }
 0x11a   : > { %423 = vst [vmem:[%s184_s16] sm:$0x3] %v422_v58 }
 0x11b PF: > { %s14_s12 = sadd.s32 1, %s652_s12  }
 0x11c   : > { %p11_p5 = scmp.ge.s32.totalorder %s14_s12, 4  }
 0x11e   :  { %13 = sbr.rel (!%p11_p5) target bundleno = 1 (0x1), region = 70 }

</bundles_post_ra>
